<compile_context>
chip_gen: v6e
topology: v6e:2x2x1
jax: 0.10.0
libtpu: 0.0.40
codegen_flags: <defaults>
</compile_context>

<pallas_src>
import jax
import jax.numpy as jnp
from jax.experimental import pallas as pl
from jax.experimental.pallas import tpu as pltpu


def _round_up(x, m):
    return (x + m - 1) // m * m


def borep_kernel(x_ref, w_ref, b_ref, len_ref, out_ref):
    t = pl.program_id(1)                       # time (reduction) axis, innermost

    @pl.when(t == 0)
    def _():
        out_ref[...] = jnp.full_like(out_ref, -jnp.inf)

    tt, tb, din = x_ref.shape
    dout = out_ref.shape[1]

    # One large matmul per grid step: (tt*tb, din) @ (din, dout).
    xm = x_ref[...].reshape(tt * tb, din)
    emb = jnp.dot(xm, w_ref[...], preferred_element_type=jnp.float32)
    emb = emb.reshape(tt, tb, dout)

    # Length mask: global time index = t*tt + local offset along the time tile.
    time_idx = t * tt + jax.lax.broadcasted_iota(jnp.int32, (tt, tb, 1), 0)
    valid = time_idx < len_ref[...][None, :, :]            # (tt, tb, 1)
    masked = jnp.where(valid, emb, -jnp.inf)               # (tt, tb, dout)

    # Reduce the time tile in-register, then fold into the resident accumulator.
    out_ref[...] = jnp.maximum(out_ref[...], jnp.max(masked, axis=0))

    # Bias hoisted out of the time loop; activation is identity.
    @pl.when(t == pl.num_programs(1) - 1)
    def _():
        out_ref[...] = out_ref[...] + b_ref[...]


def borep_forward(x, weight_t, bias, lengths, *, time_tile=None, batch_tile=None):
    """x: (S, B, Din) f32 (time-major, like the PyTorch module);
    weight_t: (Din, Dout) f32 (= proj.weight.T); bias: (Dout,) f32;
    lengths: (B,) int32.  Returns (B, Dout) f32 (masked max-pool over time)."""
    S, B, Din = x.shape
    Dout = weight_t.shape[1]

    # Lane-dense output: pad Dout to a multiple of 128 so accumulator stores are
    # full vector stores rather than masked partial stores; slice afterwards.
    Dout_p = _round_up(Dout, 128)

    # Batch tile: whole (sublane-padded) batch when small, else 128-row tiles.
    # With Tb == padded B the (Tt, Tb, Din) x tile is a fully contiguous DMA.
    if batch_tile is None:
        batch_tile = min(_round_up(B, 8), 128)
    Tb = batch_tile
    B_p = _round_up(B, Tb)

    # Time tile: target ~2 MiB per x tile (double-buffered by the pipeline) so
    # DMAs are large and per-grid-step overhead (~0.35 us) is amortized.
    if time_tile is None:
        bytes_per_step = Tb * Din * 4
        time_tile = max(1, min(S, (2 << 20) // max(bytes_per_step, 1)))
    Tt = time_tile
    S_p = _round_up(S, Tt)

    # Zero-pad: padded time/batch positions are masked out by the length mask
    # (index >= length, padded lengths = 0); padded Dout columns are sliced off.
    xp = jnp.pad(x.astype(jnp.float32), ((0, S_p - S), (0, B_p - B), (0, 0)))
    wp = jnp.pad(weight_t.astype(jnp.float32), ((0, 0), (0, Dout_p - Dout)))
    bp = jnp.pad(bias.astype(jnp.float32), (0, Dout_p - Dout)).reshape(1, Dout_p)
    lp = jnp.pad(lengths.astype(jnp.int32), (0, B_p - B)).reshape(B_p, 1)

    nb, nt = B_p // Tb, S_p // Tt

    # Explicit VMEM budget (v7x: 64 MiB physical / 32 MiB scoped default;
    # v5e scoped default is 16 MiB).  Double-buffered inputs + accumulator.
    need = 2 * (Tt * Tb * Din * 4        # x tile
                + Din * Dout_p * 4       # resident weight
                + Dout_p * 4             # bias
                + Tb * 128 * 4           # lengths (lane-padded)
                + Tb * Dout_p * 4)       # accumulator / output tile
    vmem_limit = int(min(max(need + (4 << 20), 16 << 20), 48 << 20))

    out = pl.pallas_call(
        borep_kernel,
        out_shape=jax.ShapeDtypeStruct((B_p, Dout_p), jnp.float32),
        grid_spec=pltpu.PrefetchScalarGridSpec(
            num_scalar_prefetch=0,
            grid=(nb, nt),                                          # (batch, time)
            in_specs=[
                pl.BlockSpec((Tt, Tb, Din), lambda b, t: (t, b, 0)),  # x tile
                pl.BlockSpec((Din, Dout_p), lambda b, t: (0, 0)),     # W^T (full)
                pl.BlockSpec((1, Dout_p), lambda b, t: (0, 0)),       # bias
                pl.BlockSpec((Tb, 1), lambda b, t: (b, 0)),           # lengths
            ],
            out_specs=pl.BlockSpec((Tb, Dout_p), lambda b, t: (b, 0)),  # resident acc
        ),
        compiler_params=pltpu.CompilerParams(
            dimension_semantics=("parallel", "arbitrary"),
            vmem_limit_bytes=vmem_limit,
        ),
    )(xp, wp, bp, lp)

    return out[:B, :Dout]


def borep_reference(x, weight_t, bias, lengths):
    # Pure-JAX reference: per-step linear, masked max pool over time.
    S, B, _ = x.shape
    emb = jnp.einsum("sbi,io->sbo", x, weight_t) + bias[None, None, :]
    t = jnp.arange(S)[:, None, None]
    mask = t < lengths[None, :, None]
    masked = jnp.where(mask, emb, -jnp.inf)
    return jnp.max(masked, axis=0)


if __name__ == "__main__":
    # Deterministic synthetic setup (params: input_dim=32, output_dim=64,
    # init='uniform' in [-0.1, 0.1], bias=0, pooling='max', activation=None).
    key = jax.random.PRNGKey(0)
    kx, kw, kl = jax.random.split(key, 3)

    S, B, Din, Dout = 8, 8, 32, 64

    x = jax.random.normal(kx, (S, B, Din), dtype=jnp.float32)
    # nn.init.uniform_(proj.weight, a=-0.1, b=0.1); torch weight is (Dout, Din),
    # stored transposed here so the kernel computes x @ W^T + b.
    weight = jax.random.uniform(kw, (Dout, Din), minval=-0.1, maxval=0.1,
                                dtype=jnp.float32)
    weight_t = weight.T
    bias = jnp.zeros((Dout,), dtype=jnp.float32)   # nn.init.constant_(bias, 0)
    lengths = jax.random.randint(kl, (B,), 1, S + 1, dtype=jnp.int32)

    out = borep_forward(x, weight_t, bias, lengths)
    out = jax.block_until_ready(out)

    ref = borep_reference(x, weight_t, bias, lengths)
    assert out.shape == (B, Dout)
    assert jnp.allclose(out, ref, atol=1e-5, rtol=1e-5), "mismatch vs reference"

    print("KERNEL_OK")
</pallas_src>

<mosaic_0001>
module attributes {stable_mosaic.version = 11 : i64} {
  func.func @borep_kernel(%arg0: i32, %arg1: i32, %arg2: memref<8x8x32xf32, #tpu.memory_space<vmem>>, %arg3: memref<32x128xf32, #tpu.memory_space<vmem>>, %arg4: memref<1x128xf32, #tpu.memory_space<vmem>>, %arg5: memref<8x1xi32, #tpu.memory_space<vmem>>, %arg6: memref<8x128xf32, #tpu.memory_space<vmem>>) attributes {dimension_semantics = [#tpu.dimension_semantics<parallel>, #tpu.dimension_semantics<arbitrary>], iteration_bounds = array<i64: 1, 1>, scalar_prefetch = 0 : i64, scratch_operands = 0 : i64, tpu.core_type = #tpu.core_type<tc>, window_params = [{transform_indices = @transform_0, window_bounds = array<i64: 8, 8, 32>}, {pipeline_mode = #tpu.pipeline_mode<synchronous>, transform_indices = @transform_1, window_bounds = array<i64: 32, 128>}, {pipeline_mode = #tpu.pipeline_mode<synchronous>, transform_indices = @transform_2, window_bounds = array<i64: 1, 128>}, {transform_indices = @transform_3, window_bounds = array<i64: 8, 1>}, {transform_indices = @transform_4, window_bounds = array<i64: 8, 128>}]} {
    %c0_i32 = arith.constant 0 : i32
    %0 = arith.cmpi eq, %arg1, %c0_i32 : i32
    %1 = arith.extui %0 : i1 to i32
    %c0_i32_0 = arith.constant 0 : i32
    %2 = arith.cmpi ne, %1, %c0_i32_0 : i32
    scf.if %2 {
      %cst_15 = arith.constant 0xFF800000 : f32
      %27 = vector.broadcast %cst_15 : f32 to vector<8x128xf32>
      %c0_16 = arith.constant 0 : index
      %c0_17 = arith.constant 0 : index
      %28 = vector.load %arg6[%c0_16, %c0_17] : memref<8x128xf32, #tpu.memory_space<vmem>>, vector<8x128xf32>
      tpu.vector_store %arg6[%c0_16, %c0_17], %27 {strides = array<i32>} : memref<8x128xf32, #tpu.memory_space<vmem>>, vector<8x128xf32>,
    } else {
    }
    %c0 = arith.constant 0 : index
    %c0_1 = arith.constant 0 : index
    %c0_2 = arith.constant 0 : index
    %3 = vector.load %arg2[%c0, %c0_1, %c0_2] : memref<8x8x32xf32, #tpu.memory_space<vmem>>, vector<8x8x32xf32>
    %4 = vector.shape_cast %3 : vector<8x8x32xf32> to vector<64x32xf32>
    %c0_3 = arith.constant 0 : index
    %c0_4 = arith.constant 0 : index
    %5 = vector.load %arg3[%c0_3, %c0_4] : memref<32x128xf32, #tpu.memory_space<vmem>>, vector<32x128xf32>
    %cst = arith.constant dense<0.000000e+00> : vector<64x128xf32>
    %6 = tpu.matmul %4, %5, %cst {dimension_numbers = #tpu.dot_dimension_numbers<[1], [0], [0], [1], [0, 0, 1, 1], [], []>} : vector<64x32xf32>, vector<32x128xf32>, vector<64x128xf32> -> vector<64x128xf32>
    %7 = vector.shape_cast %6 : vector<64x128xf32> to vector<8x8x128xf32>
    %c8_i32 = arith.constant 8 : i32
    %8 = arith.muli %arg1, %c8_i32 : i32
    %9 = tpu.iota {dimensions = array<i32: 0>} : vector<8x8x1xi32>
    %10 = vector.broadcast %8 : i32 to vector<8x8x1xi32>
    %11 = arith.addi %10, %9 : vector<8x8x1xi32>
    %c0_5 = arith.constant 0 : index
    %c0_6 = arith.constant 0 : index
    %12 = vector.load %arg5[%c0_5, %c0_6] : memref<8x1xi32, #tpu.memory_space<vmem>>, vector<8x1xi32>
    %13 = vector.shape_cast %12 : vector<8x1xi32> to vector<1x8x1xi32>
    %14 = vector.broadcast %13 : vector<1x8x1xi32> to vector<8x8x1xi32>
    %15 = arith.cmpi slt, %11, %14 : vector<8x8x1xi32>
    %cst_7 = arith.constant 0xFF800000 : f32
    %16 = vector.shape_cast %15 : vector<8x8x1xi1> to vector<8x8x1xi1>
    %17 = vector.broadcast %16 : vector<8x8x1xi1> to vector<8x8x128xi1>
    %18 = vector.broadcast %cst_7 : f32 to vector<8x8x128xf32>
    %19 = arith.select %17, %7, %18 : vector<8x8x128xi1>, vector<8x8x128xf32>
    %c0_8 = arith.constant 0 : index
    %c0_9 = arith.constant 0 : index
    %20 = vector.load %arg6[%c0_8, %c0_9] : memref<8x128xf32, #tpu.memory_space<vmem>>, vector<8x128xf32>
    %cst_10 = arith.constant dense<0xFF800000> : vector<8x128xf32>
    %21 = vector.multi_reduction <maximumf>, %19, %cst_10 [0] : vector<8x8x128xf32> to vector<8x128xf32>
    %22 = arith.maximumf %20, %21 : vector<8x128xf32>
    %c0_11 = arith.constant 0 : index
    %c0_12 = arith.constant 0 : index
    %23 = vector.load %arg6[%c0_11, %c0_12] : memref<8x128xf32, #tpu.memory_space<vmem>>, vector<8x128xf32>
    tpu.vector_store %arg6[%c0_11, %c0_12], %22 {strides = array<i32>} : memref<8x128xf32, #tpu.memory_space<vmem>>, vector<8x128xf32>,
    %c0_i32_13 = arith.constant 0 : i32
    %24 = arith.cmpi eq, %arg1, %c0_i32_13 : i32
    %25 = arith.extui %24 : i1 to i32
    %c0_i32_14 = arith.constant 0 : i32
    %26 = arith.cmpi ne, %25, %c0_i32_14 : i32
    scf.if %26 {
      %c0_15 = arith.constant 0 : index
      %c0_16 = arith.constant 0 : index
      %27 = vector.load %arg6[%c0_15, %c0_16] : memref<8x128xf32, #tpu.memory_space<vmem>>, vector<8x128xf32>
      %c0_17 = arith.constant 0 : index
      %c0_18 = arith.constant 0 : index
      %28 = vector.load %arg4[%c0_17, %c0_18] : memref<1x128xf32, #tpu.memory_space<vmem>>, vector<1x128xf32>
      %29 = vector.broadcast %28 : vector<1x128xf32> to vector<8x128xf32>
      %30 = arith.addf %27, %29 : vector<8x128xf32>
      %c0_19 = arith.constant 0 : index
      %c0_20 = arith.constant 0 : index
      %31 = vector.load %arg6[%c0_19, %c0_20] : memref<8x128xf32, #tpu.memory_space<vmem>>, vector<8x128xf32>
      tpu.vector_store %arg6[%c0_19, %c0_20], %30 {strides = array<i32>} : memref<8x128xf32, #tpu.memory_space<vmem>>, vector<8x128xf32>,
    } else {
    }
    return
  }
  func.func @transform_0(%arg0: i32, %arg1: i32) -> (i32, i32, i32) {
    %c0_i32 = arith.constant 0 : i32
    %c0_i32_0 = arith.constant 0 : i32
    return %arg1, %arg0, %c0_i32 : i32, i32, i32
  }
  func.func @transform_1(%arg0: i32, %arg1: i32) -> (i32, i32) {
    %c0_i32 = arith.constant 0 : i32
    %c0_i32_0 = arith.constant 0 : i32
    %c0_i32_1 = arith.constant 0 : i32
    return %c0_i32, %c0_i32_0 : i32, i32
  }
  func.func @transform_2(%arg0: i32, %arg1: i32) -> (i32, i32) {
    %c0_i32 = arith.constant 0 : i32
    %c0_i32_0 = arith.constant 0 : i32
    %c0_i32_1 = arith.constant 0 : i32
    return %c0_i32, %c0_i32_0 : i32, i32
  }
  func.func @transform_3(%arg0: i32, %arg1: i32) -> (i32, i32) {
    %c0_i32 = arith.constant 0 : i32
    %c0_i32_0 = arith.constant 0 : i32
    return %arg0, %c0_i32 : i32, i32
  }
  func.func @transform_4(%arg0: i32, %arg1: i32) -> (i32, i32) {
    %c0_i32 = arith.constant 0 : i32
    %c0_i32_0 = arith.constant 0 : i32
    return %arg0, %c0_i32 : i32, i32
  }
}

</mosaic_0001>

<bundles_post_ra>
// kernel: tpu_custom_call.1
= control target key start
LH: loop header
LB: loop body
LE: loop exit
PB: predicated region body
PF: predicated region fallthrough
CT: control target
= control target key end

     0   :  { %9 = vsyncpa [#allocation3], 0  ;;  %s484_s0 = inlined_call_operand.hbm [shape: f32[8,8,32], index: 0, kind: input, shape index: {}]   ;;  %s485_s1 = inlined_call_operand.hbm [shape: f32[32,128], index: 1, kind: input, shape index: {}]   ;;  %s486_s2 = inlined_call_operand.vmem [shape: f32[1,128], index: 2, kind: input, shape index: {}]   ;;  %s487_s3 = inlined_call_operand.vmem [shape: s32[8,1], index: 3, kind: input, shape index: {}]   ;;  %s488_s4 = inlined_call_operand.hbm [shape: f32[8,128], index: 4, kind: output, shape index: {}]  }
   0x1   :  { %10 = vsyncpa [#allocation6], 0 }
   0x2   :  { %11 = vsyncpa [#allocation4], 0  ;;  %s430_s15 = smov [#allocation2]  }
   0x3   :  { %s17_s16 = sshll.u32 %s430_s15, 4  ;;  %s18_s16 = int_to_ptr.vmem [resolvable:$true] %s17_s16 }
   0x4   :  { %s372_s17 = scalar_lea.vmem %s18_s16, 1024  ;;  %p377_p1 = scmp.lt.s32.totalorder %s18_s16, %s18_s16 }
   0x5   :  { %p373_p0 = scmp.ne.s32.totalorder %s18_s16, %s372_s17  ;;  %p378_p2 = scmp.lt.s32.totalorder %s372_s17, %s372_s17 }
   0x7   :  { %p379_p3 = por %p378_p2, %p377_p1 }
   0x9   :  { %p380_p4 = pnand %p379_p3, %p373_p0 }
   0xb   :  { %383 = shalt.err (!%p380_p4)
}
   0xc   :  { %s431_s18 = smov 128   ;;  %s432_s19 = smov 8  }
   0xd   :  { %23 = dma.hbm_to_vmem [thread:$0]  %s484_s0, 1024, %s18_s16, [#allocation3], %s431_s18, %s431_s18, %s432_s19  }
   0xe   :  { %s433_s22 = smov [#allocation5]  }
   0xf   :  { %s29_s23 = sshll.u32 %s433_s22, 4  ;;  %s30_s23 = int_to_ptr.vmem [resolvable:$true] %s29_s23 }
  0x10   :  { %s392_s24 = scalar_lea.vmem %s30_s23, 512  ;;  %p397_p6 = scmp.lt.s32.totalorder %s30_s23, %s30_s23 }
  0x11   :  { %p393_p5 = scmp.ne.s32.totalorder %s30_s23, %s392_s24  ;;  %p398_p7 = scmp.lt.s32.totalorder %s392_s24, %s392_s24 }
  0x13   :  { %p399_p8 = por %p398_p7, %p397_p6 }
  0x15   :  { %p400_p9 = pnand %p399_p8, %p393_p5 }
  0x17   :  { %403 = shalt.err (!%p400_p9)
}
  0x18   :  { %35 = dma.hbm_to_vmem [thread:$0]  %s485_s1, 512, %s30_s23, [#allocation6], %s431_s18, %s431_s18, %s432_s19  }
  0x19   :  { %424 = dma.done.wait [#allocation3], 1024  }
  0x1a   :  { %425 = vsyncadd [#allocation3], 4294966272 }
  0x1b   :  { %426 = dma.done.wait [#allocation6], 512  }
  0x1c   :  { %427 = vsyncadd [#allocation6], 4294966784  ;;  %v434_v0 = vmov 0   ;;  %v62_v1 = vld [vmem:[#allocation5 + $0x18] sm:$0xff]  ;;  %v61_v2 = vld [vmem:[#allocation5 + $0x10] sm:$0xff]  ;;  %vm63_vm0 = vcmask 261120  }
  0x1d   :  { %363 = vset.pattern.permute.xlu1 %v434_v0  ;;  %362 = vset.pattern.permute.xlu0 %v434_v0  ;;  %v60_v3 = vld [vmem:[#allocation5 + $0x8] sm:$0xff]  ;;  %v59_v4 = vld [vmem:[#allocation5] sm:$0xff]  ;;  %v53_v10 = vld [vmem:[#allocation2 + $0x10] sm:$0xff]  ;;  %s435_s28 = smov [#allocation7]  }
  0x1e   :  { %327 = vmatprep.subr.mxu0 %v62_v1  ;;  %347 = vmatprep.subr.mxu1 %v62_v1  ;;  %v202_v5 = vld [vmem:[%s487_s3] sm:$0xff]  ;;  %v52_v8 = vld [vmem:[#allocation2 + $0x8] sm:$0xff]  ;;  %v57_v11 = vld [vmem:[#allocation2 + $0x30] sm:$0xff]  ;;  %s288_s29 = sshll.u32 %s435_s28, 4  ;;  %s289_s29 = int_to_ptr.vmem [resolvable:$true] %s288_s29 }
  0x1f   :  { %328 = vmatpush3.msra.mxu0 %v62_v1  ;;  %351 = vmatpush3.msra.mxu1 %v62_v1  ;;  %v51_v6 = vld [vmem:[#allocation2] sm:$0xff]  ;;  %vm308_vm1 = vcmp.gt.s32.totalorder %v202_v5, 2  ;;  %vm306_vm2 = vcmp.gt.s32.totalorder %v202_v5, 0  ;;  %v56_v9 = vld [vmem:[#allocation2 + $0x28] sm:$0xff]  ;;  %vm309_vm3 = vcmp.gt.s32.totalorder %v202_v5, 3  ;;  %vm307_vm4 = vcmp.gt.s32.totalorder %v202_v5, 1  ;;  %p409_p11 = scmp.lt.s32.totalorder %s289_s29, %s289_s29 }
  0x20   :  { %329 = vmatprep.subr.mxu0 %v61_v2  ;;  %348 = vmatprep.subr.mxu1 %v61_v2  ;;  %v55_v7 = vld [vmem:[#allocation2 + $0x20] sm:$0xff]  ;;  %v213_v12 = vsel %vm308_vm1, 1, %v434_v0  ;;  %v211_v13 = vsel %vm306_vm2, 1, %v434_v0  ;;  %v54_v14 = vld [vmem:[#allocation2 + $0x18] sm:$0xff]  ;;  %v214_v16 = vsel %vm309_vm3, 1, %v434_v0  ;;  %v212_v17 = vsel %vm307_vm4, 1, %v434_v0 }
  0x21   :  { %330 = vmatpush3.msra.mxu0 %v61_v2  ;;  %352 = vmatpush3.msra.mxu1 %v61_v2  ;;  %v58_v15 = vld [vmem:[#allocation2 + $0x38] sm:$0xff]  ;;  %vm311_vm5 = vcmp.gt.s32.totalorder %v202_v5, 5  ;;  %vm310_vm6 = vcmp.gt.s32.totalorder %v202_v5, 4  ;;  %vm313_vm7 = vcmp.gt.s32.totalorder %v202_v5, 7  ;;  %vm312_vm8 = vcmp.gt.s32.totalorder %v202_v5, 6  ;;  %s404_s30 = scalar_lea.vmem %s289_s29, 128 }
  0x22   :  { %331 = vmatprep.subr.mxu0 %v60_v3  ;;  %349 = vmatprep.subr.mxu1 %v60_v3  ;;  %v216_v18 = vsel %vm311_vm5, 1, %v434_v0  ;;  %v215_v19 = vsel %vm310_vm6, 1, %v434_v0  ;;  %v218_v20 = vsel %vm313_vm7, 1, %v434_v0  ;;  %v217_v21 = vsel %vm312_vm8, 1, %v434_v0  ;;  %v314_v53 = vld [vmem:[%s486_s2] ss:$0 sm:$0xff]  ;;  %p405_p10 = scmp.ne.s32.totalorder %s289_s29, %s404_s30  ;;  %p410_p12 = scmp.lt.s32.totalorder %s404_s30, %s404_s30 }
  0x23   :  { %332 = vmatpush3.msra.mxu0 %v60_v3  ;;  %353 = vmatpush3.msra.mxu1 %v60_v3 }
  0x24   :  { %333 = vmatprep.subr.mxu0 %v59_v4  ;;  %350 = vmatprep.subr.mxu1 %v59_v4  ;;  %p411_p13 = por %p410_p12, %p409_p11 }
  0x25   :  { %334 = vmatpush3.msra.mxu0 %v59_v4  ;;  %354 = vmatpush3.msra.mxu1 %v59_v4 }
  0x26   :  { %335 = vmatprep.mubr.msk.f32.mxu0 %vm63_vm0, %v51_v6  ;;  %341 = vmatprep.mubr.msk.f32.mxu1 %vm63_vm0, %v55_v7  ;;  %p412_p0 = pnand %p411_p13, %p405_p10 }
  0x27   :  { %336 = vmatmul.mubr.msk.f32.vlgmr.msra.gmra.mxu0 %vm63_vm0, %v52_v8  ;;  %342 = vmatmul.mubr.msk.f32.vlgmr.msra.gmra.mxu1 %vm63_vm0, %v56_v9 }
  0x28   :  { %338 = vmatprep.mubr.msk.f32.mxu0 %vm63_vm0, %v53_v10  ;;  %344 = vmatprep.mubr.msk.f32.mxu1 %vm63_vm0, %v57_v11 }
  0x29   :  { %226 = vperm.xlu1 %363, %v213_v12   ;;  %220 = vperm.xlu0 %362, %v211_v13  }
  0x2b   :  { %339 = vmatmul.mubr.msk.f32.gmra.mxu0 %vm63_vm0, %v54_v14  ;;  %345 = vmatmul.mubr.msk.f32.gmra.mxu1 %vm63_vm0, %v58_v15 }
  0x2d   :  { %229 = vperm.xlu1 %363, %v214_v16   ;;  %223 = vperm.xlu0 %362, %v212_v17  }
  0x31   :  { %235 = vperm.xlu1 %363, %v216_v18   ;;  %232 = vperm.xlu0 %362, %v215_v19  }
  0x35   :  { %241 = vperm.xlu1 %363, %v218_v20   ;;  %238 = vperm.xlu0 %362, %v217_v21  }
  0xa4   :  { %v227_v22 = vpop.permute.xlu1 %226  ;;  %v221_v23 = vpop.permute.xlu0 %220 }
  0xa5   :  { %vm243_vm9 = vcmp.eq.s32.totalorder %v221_v23, 1  ;;  %vm245_vm15 = vcmp.eq.s32.totalorder %v227_v22, 1 }
  0xa8   :  { %v230_v24 = vpop.permute.xlu1 %229  ;;  %v224_v25 = vpop.permute.xlu0 %223 }
  0xa9   :  { %vm246_vm11 = vcmp.eq.s32.totalorder %v230_v24, 1  ;;  %vm244_vm12 = vcmp.eq.s32.totalorder %v224_v25, 1 }
  0xac   :  { %v236_v26 = vpop.permute.xlu1 %235  ;;  %v233_v27 = vpop.permute.xlu0 %232 }
  0xad   :  { %vm247_vm10 = vcmp.eq.s32.totalorder %v233_v27, 1  ;;  %vm248_vm13 = vcmp.eq.s32.totalorder %v236_v26, 1 }
  0xb0   :  { %v242_v30 = vpop.permute.xlu1 %241  ;;  %v239_v33 = vpop.permute.xlu0 %238 }
  0xb1   :  { %vm250_vm14 = vcmp.eq.s32.totalorder %v242_v30, 1  ;;  %vm249_vm0 = vcmp.eq.s32.totalorder %v239_v33, 1 }
  0xe7   :  { %v337_v28 = vpop.f32.mrf.mxu0  ;;  %v343_v29 = vpop.f32.mrf.mxu1 }
  0xe8   :  { %v252_v38 = vsel %vm244_vm12, %v337_v28, -inf  ;;  %v256_v39 = vsel %vm248_vm13, %v343_v29, -inf }
  0xe9   :  { %v154_v31 = vpop.f32.mrf.mxu0  ;;  %v174_v32 = vpop.f32.mrf.mxu1  ;;  %v261_v47 = vmax.f32 %v252_v38, %v256_v39 }
  0xea   :  { %v251_v34 = vsel %vm243_vm9, %v154_v31, -inf  ;;  %v255_v35 = vsel %vm247_vm10, %v174_v32, -inf }
  0xeb   :  { %v340_v36 = vpop.f32.mrf.mxu0  ;;  %v346_v37 = vpop.f32.mrf.mxu1  ;;  %v260_v42 = vmax.f32 %v251_v34, %v255_v35 }
  0xec   :  { %v254_v40 = vsel %vm246_vm11, %v340_v36, -inf  ;;  %v258_v41 = vsel %vm250_vm14, %v346_v37, -inf }
  0xed   :  { %v164_v43 = vpop.f32.mrf.mxu0  ;;  %v184_v44 = vpop.f32.mrf.mxu1  ;;  %v263_v48 = vmax.f32 %v254_v40, %v258_v41  ;;  %v264_v50 = vmax.f32 %v260_v42, %v261_v47 }
  0xee   :  { %v253_v45 = vsel %vm245_vm15, %v164_v43, -inf  ;;  %v257_v46 = vsel %vm249_vm0, %v184_v44, -inf }
  0xef   :  { %v262_v49 = vmax.f32 %v253_v45, %v257_v46 }
  0xf1   :  { %v265_v51 = vmax.f32 %v262_v49, %v263_v48 }
  0xf3   :  { %v266_v52 = vmax.f32 %v264_v50, %v265_v51 }
  0xf5   :  { %v280_v54 = vadd.f32 %v314_v53, %v266_v52 }
  0xf7   :  { %281 = vst [vmem:[#allocation7] sm:$0xff] %v280_v54 }
  0xf8   :  { %415 = shalt.err (!%p412_p0)
}
  0xf9   :  { %291 = dma.vmem_to_hbm [thread:$0]  %s289_s29, 128, %s488_s4, [#allocation4]  }
  0xfa   :  { %428 = dma.done.wait [#allocation4], 128  }
  0xfb   :  { %429 = vsyncadd [#allocation4], 4294967168 }
  0xfc   :  { %295 = vsyncpa [#allocation3], 1 }
  0xfd   :  { %296 = vsyncpa [#allocation6], 1 }
  0xfe   :  { %297 = vsyncpa [#allocation4], 1 }

</bundles_post_ra>
